<compile_context>
chip_gen: v7x
topology: tpu7x:2x2x1
jax: 0.10.0
libtpu: 0.0.40
codegen_flags: <defaults>
</compile_context>

<pallas_src>
import jax
import jax.numpy as jnp
import numpy as np
from jax import lax
from jax.experimental import pallas as pl
from jax.experimental.pallas import tpu as pltpu

INPUT_CHANNELS = 14
KERNEL_SIZE = 3
HIDDEN_DIM = 32
OUT_DIM = 1
SEQ_LEN = 32          # five stride-2 convs reduce 32 -> 1 (required by Linear(8, hidden_dim))
BATCH = 2
CONV_STRIDES = (1, 2, 2, 2, 2, 2)
WCOLS = 256           # lane width of the packed weight / bias buffers (max stage width)


# ----------------------------- glue: conv -> dense matmul ----------------------------- #
def conv_out_len(L, k, s, p):
    return (L + 2 * p - k) // s + 1


def conv1d_to_dense(w, b, L_in, stride, pad):
    """Dense matrix M (Ci*L_in, Co*L_out) and bias (1, Co*L_out) equal to the Conv1d
    acting on the channel-major flattening (index = c*L + t)."""
    Co, Ci, K = w.shape
    L_out = conv_out_len(L_in, K, stride, pad)
    S = np.zeros((K, L_in, L_out), dtype=np.float32)
    for t in range(L_out):
        for k in range(K):
            tau = stride * t - pad + k
            if 0 <= tau < L_in:
                S[k, tau, t] = 1.0
    S = jnp.asarray(S)
    M = jnp.einsum('oik,kab->iaob', w, S).reshape(Ci * L_in, Co * L_out)
    b_full = jnp.repeat(b, L_out).reshape(1, Co * L_out)
    return M, b_full, L_out


# --------------------------- packing (trace-time, plain JAX/numpy) --------------------------- #
def build_packed_params(raw):
    """Lower convs to dense, fold the ReLU-free linear chain, and pack everything into
    one bf16 weight buffer + one f32 bias buffer.  Returns static stage layout too."""
    mats, biases = [], []
    L = SEQ_LEN
    for i, s in enumerate(CONV_STRIDES, start=1):
        M, bfull, L = conv1d_to_dense(raw[f'w{i}'], raw[f'b{i}'], L, s, 1)
        mats.append(M)
        biases.append(bfull)
    assert L == 1, "sequence length must reduce to 1 before Flatten/Linear(8, hidden)"

    # Fold conv6-dense @ lw0.T @ lw1.T (no nonlinearity between them); ReLU follows lw1.
    M6, b6 = mats.pop(), biases.pop()
    A = M6 @ raw['lw0'].T @ raw['lw1'].T                                        # (16, 32)
    c = (b6 @ raw['lw0'].T + raw['lb0'][None, :]) @ raw['lw1'].T + raw['lb1'][None, :]
    mats.append(A)
    biases.append(c)

    # regressor Linear(hidden, hidden//2) (+ReLU)
    mats.append(raw['lw2'].T)
    biases.append(raw['lb2'][None, :])

    # final Linear(hidden//2, 1): stored as a single weight ROW -> VPU stage in-kernel.
    lw3_row_mat = raw['lw3']            # (1, 16)
    lw3_bias = raw['lb3'][None, :]      # (1, 1)

    n_rows_total = sum(((m.shape[0] + 15) // 16) * 16 for m in mats) + 16       # = 992
    wbuf = np.zeros((n_rows_total, WCOLS), np.float32)
    bbuf = np.zeros((8, WCOLS), np.float32)

    stages = []                         # (row_offset, K, N, relu) — static Python ints
    row = 0
    for si, (m, b) in enumerate(zip(mats, biases)):
        k, n = int(m.shape[0]), int(m.shape[1])
        wbuf[row:row + k, :n] = np.asarray(m)
        bbuf[si, :n] = np.asarray(b)[0]
        stages.append((row, k, n, True))
        row += ((k + 15) // 16) * 16    # keep bands aligned to bf16 sublane packing
    lw3_row = row
    lw3_width = int(lw3_row_mat.shape[1])
    wbuf[lw3_row:lw3_row + 1, :lw3_width] = np.asarray(lw3_row_mat)
    bbuf[len(mats), :1] = np.asarray(lw3_bias)[0]

    return (jnp.asarray(wbuf, jnp.bfloat16),
            jnp.asarray(bbuf, jnp.float32),
            stages, lw3_row, lw3_width)


# ------------------------------------ Pallas kernel ------------------------------------ #
def make_cnn_kernel(stages, lw3_row, lw3_width):
    def kernel(x_ref, w_ref, b_ref, out_ref):
        h = x_ref[...]                                       # (bb, Ci*L) bf16
        for si, (ro, k, n, relu) in enumerate(stages):       # unrolled at trace time
            w = w_ref[ro:ro + k, 0:n]                        # bf16 weight band (static slice)
            b = b_ref[si:si + 1, 0:n]                        # f32 bias row
            y = jnp.dot(h.astype(jnp.bfloat16), w,
                        preferred_element_type=jnp.float32) + b
            h = jnp.maximum(y, 0.0) if relu else y           # f32 activations
        # TODO(synk): nn.Dropout is identity in eval mode; training-mode RNG dropout omitted.
        # final Linear(hidden//2, 1): VPU broadcast-multiply + lane reduce (no MXU round-trip)
        w_last = w_ref[lw3_row:lw3_row + 1, 0:lw3_width].astype(jnp.float32)   # (1, 16)
        b_last = b_ref[len(stages):len(stages) + 1, 0:1]                       # (1, 1)
        out_ref[...] = (jnp.sum(h * w_last, axis=-1, keepdims=True)
                        + b_last).astype(out_ref.dtype)
    return kernel


def cnn_forward(x, wbuf, bbuf, stages, lw3_row, lw3_width):
    B = x.shape[0]
    x_flat = x.reshape(B, -1).astype(jnp.bfloat16)           # channel-major (c*L + t)
    feat = x_flat.shape[1]

    bb = min(128, ((B + 15) // 16) * 16)                     # rows per grid step
    b_pad = ((B + bb - 1) // bb) * bb
    if b_pad != B:
        x_flat = jnp.pad(x_flat, ((0, b_pad - B), (0, 0)))

    kernel = make_cnn_kernel(stages, lw3_row, lw3_width)

    flops = 2 * b_pad * (sum(k * n for _, k, n, _ in stages) + lw3_width)
    bytes_accessed = (x_flat.size * 2 + wbuf.size * 2 + bbuf.size * 4 + b_pad * OUT_DIM * 4)

    out = pl.pallas_call(
        kernel,
        out_shape=jax.ShapeDtypeStruct((b_pad, OUT_DIM), jnp.float32),
        grid_spec=pltpu.PrefetchScalarGridSpec(
            num_scalar_prefetch=0,
            grid=(b_pad // bb,),
            in_specs=[pl.BlockSpec((bb, feat), lambda i: (i, 0)),
                      pl.BlockSpec(wbuf.shape, lambda i: (0, 0)),   # resident across grid
                      pl.BlockSpec(bbuf.shape, lambda i: (0, 0))],
            out_specs=pl.BlockSpec((bb, OUT_DIM), lambda i: (i, 0))),
        compiler_params=pltpu.CompilerParams(dimension_semantics=("parallel",)),
        cost_estimate=pl.CostEstimate(flops=flops, transcendentals=0,
                                      bytes_accessed=bytes_accessed),
    )(x_flat, wbuf, bbuf)
    return out[:B]


# --------------------------------- parameter construction --------------------------------- #
def uniform_init(key, shape, fan_in):
    bound = 1.0 / np.sqrt(fan_in)
    return jax.random.uniform(key, shape, jnp.float32, -bound, bound)


def init_raw_params(key):
    ks = jax.random.split(key, 20)
    raw = {}
    raw['w1'] = uniform_init(ks[0], (8, INPUT_CHANNELS, KERNEL_SIZE), INPUT_CHANNELS * KERNEL_SIZE)
    raw['b1'] = uniform_init(ks[1], (8,), INPUT_CHANNELS * KERNEL_SIZE)
    for i in range(2, 7):
        raw[f'w{i}'] = uniform_init(ks[2 * (i - 1)], (8, 8, 3), 8 * 3)
        raw[f'b{i}'] = uniform_init(ks[2 * (i - 1) + 1], (8,), 8 * 3)
    raw['lw0'] = uniform_init(ks[12], (HIDDEN_DIM, 8), 8)
    raw['lb0'] = uniform_init(ks[13], (HIDDEN_DIM,), 8)
    raw['lw1'] = uniform_init(ks[14], (HIDDEN_DIM, HIDDEN_DIM), HIDDEN_DIM)
    raw['lb1'] = uniform_init(ks[15], (HIDDEN_DIM,), HIDDEN_DIM)
    raw['lw2'] = uniform_init(ks[16], (HIDDEN_DIM // 2, HIDDEN_DIM), HIDDEN_DIM)
    raw['lb2'] = uniform_init(ks[17], (HIDDEN_DIM // 2,), HIDDEN_DIM)
    raw['lw3'] = uniform_init(ks[18], (OUT_DIM, HIDDEN_DIM // 2), HIDDEN_DIM // 2)
    raw['lb3'] = uniform_init(ks[19], (OUT_DIM,), HIDDEN_DIM // 2)
    return raw


# ------------------------------------ pure-JAX reference ------------------------------------ #
def reference_forward(x, raw):
    def conv(h, w, b, stride):
        y = lax.conv_general_dilated(h, w, window_strides=(stride,), padding=[(1, 1)],
                                     dimension_numbers=('NCH', 'OIH', 'NCH'))
        return y + b[None, :, None]

    h = x.reshape(x.shape[0], INPUT_CHANNELS, -1)
    h = jax.nn.relu(conv(h, raw['w1'], raw['b1'], 1))
    h = jax.nn.relu(conv(h, raw['w2'], raw['b2'], 2))
    h = jax.nn.relu(conv(h, raw['w3'], raw['b3'], 2))
    h = jax.nn.relu(conv(h, raw['w4'], raw['b4'], 2))
    h = jax.nn.relu(conv(h, raw['w5'], raw['b5'], 2))
    h = conv(h, raw['w6'], raw['b6'], 2)
    h = h.reshape(h.shape[0], -1)
    h = h @ raw['lw0'].T + raw['lb0']
    h = jax.nn.relu(h @ raw['lw1'].T + raw['lb1'])
    h = jax.nn.relu(h @ raw['lw2'].T + raw['lb2'])
    return h @ raw['lw3'].T + raw['lb3']


# -------------------------------------------- main -------------------------------------------- #
if __name__ == "__main__":
    key = jax.random.PRNGKey(0)
    k_x, k_p = jax.random.split(key)

    x = jax.random.normal(k_x, (BATCH, INPUT_CHANNELS, SEQ_LEN), jnp.float32)
    raw = init_raw_params(k_p)

    wbuf, bbuf, stages, lw3_row, lw3_width = build_packed_params(raw)

    out = cnn_forward(x, wbuf, bbuf, stages, lw3_row, lw3_width)
    out = jax.block_until_ready(out)

    ref = jax.block_until_ready(reference_forward(x, raw))
    assert out.shape == (BATCH, OUT_DIM)
    # bf16 weights/activations vs f32 reference -> loosened tolerance.
    np.testing.assert_allclose(np.asarray(out), np.asarray(ref), rtol=3e-2, atol=3e-2)

    print("KERNEL_OK")
</pallas_src>

<mosaic_0001>
module attributes {stable_mosaic.version = 11 : i64} {
  func.func @kernel(%arg0: i32, %arg1: memref<16x448xbf16, #tpu.memory_space<vmem>>, %arg2: memref<992x256xbf16, #tpu.memory_space<vmem>>, %arg3: memref<8x256xf32, #tpu.memory_space<vmem>>, %arg4: memref<16x1xf32, #tpu.memory_space<vmem>>) attributes {dimension_semantics = [#tpu.dimension_semantics<parallel>], iteration_bounds = array<i64: 1>, scalar_prefetch = 0 : i64, scratch_operands = 0 : i64, tpu.core_type = #tpu.core_type<tc>, window_params = [{transform_indices = @transform_0, window_bounds = array<i64: 16, 448>}, {pipeline_mode = #tpu.pipeline_mode<synchronous>, transform_indices = @transform_1, window_bounds = array<i64: 992, 256>}, {pipeline_mode = #tpu.pipeline_mode<synchronous>, transform_indices = @transform_2, window_bounds = array<i64: 8, 256>}, {transform_indices = @transform_3, window_bounds = array<i64: 16, 1>}]} {
    %c0 = arith.constant 0 : index
    %c0_0 = arith.constant 0 : index
    %0 = vector.load %arg1[%c0, %c0_0] : memref<16x448xbf16, #tpu.memory_space<vmem>>, vector<16x448xbf16>
    %c0_1 = arith.constant 0 : index
    %c0_2 = arith.constant 0 : index
    %1 = vector.load %arg2[%c0_1, %c0_2] : memref<992x256xbf16, #tpu.memory_space<vmem>>, vector<448x256xbf16>
    %c0_3 = arith.constant 0 : index
    %c0_4 = arith.constant 0 : index
    %2 = vector.load %arg3[%c0_3, %c0_4] : memref<8x256xf32, #tpu.memory_space<vmem>>, vector<1x256xf32>
    %cst = arith.constant dense<0.000000e+00> : vector<16x256xf32>
    %3 = tpu.matmul %0, %1, %cst {dimension_numbers = #tpu.dot_dimension_numbers<[1], [0], [0], [1], [0, 0, 1, 1], [], []>} : vector<16x448xbf16>, vector<448x256xbf16>, vector<16x256xf32> -> vector<16x256xf32>
    %4 = vector.broadcast %2 : vector<1x256xf32> to vector<16x256xf32>
    %5 = arith.addf %3, %4 : vector<16x256xf32>
    %cst_5 = arith.constant 0.000000e+00 : f32
    %6 = vector.broadcast %cst_5 : f32 to vector<16x256xf32>
    %7 = arith.maximumf %5, %6 : vector<16x256xf32>
    %c448 = arith.constant 448 : index
    %c0_6 = arith.constant 0 : index
    %8 = vector.load %arg2[%c448, %c0_6] : memref<992x256xbf16, #tpu.memory_space<vmem>>, vector<256x128xbf16>
    %c1 = arith.constant 1 : index
    %c0_7 = arith.constant 0 : index
    %9 = vector.load %arg3[%c1, %c0_7] : memref<8x256xf32, #tpu.memory_space<vmem>>, vector<1x128xf32>
    %10 = arith.truncf %7 : vector<16x256xf32> to vector<16x256xbf16>
    %cst_8 = arith.constant dense<0.000000e+00> : vector<16x128xf32>
    %11 = tpu.matmul %10, %8, %cst_8 {dimension_numbers = #tpu.dot_dimension_numbers<[1], [0], [0], [1], [0, 0, 1, 1], [], []>} : vector<16x256xbf16>, vector<256x128xbf16>, vector<16x128xf32> -> vector<16x128xf32>
    %12 = vector.broadcast %9 : vector<1x128xf32> to vector<16x128xf32>
    %13 = arith.addf %11, %12 : vector<16x128xf32>
    %cst_9 = arith.constant 0.000000e+00 : f32
    %14 = vector.broadcast %cst_9 : f32 to vector<16x128xf32>
    %15 = arith.maximumf %13, %14 : vector<16x128xf32>
    %c704 = arith.constant 704 : index
    %c0_10 = arith.constant 0 : index
    %16 = vector.load %arg2[%c704, %c0_10] : memref<992x256xbf16, #tpu.memory_space<vmem>>, vector<128x64xbf16>
    %c2 = arith.constant 2 : index
    %c0_11 = arith.constant 0 : index
    %17 = vector.load %arg3[%c2, %c0_11] : memref<8x256xf32, #tpu.memory_space<vmem>>, vector<1x64xf32>
    %18 = arith.truncf %15 : vector<16x128xf32> to vector<16x128xbf16>
    %cst_12 = arith.constant dense<0.000000e+00> : vector<16x64xf32>
    %19 = tpu.matmul %18, %16, %cst_12 {dimension_numbers = #tpu.dot_dimension_numbers<[1], [0], [0], [1], [0, 0, 1, 1], [], []>} : vector<16x128xbf16>, vector<128x64xbf16>, vector<16x64xf32> -> vector<16x64xf32>
    %20 = vector.broadcast %17 : vector<1x64xf32> to vector<16x64xf32>
    %21 = arith.addf %19, %20 : vector<16x64xf32>
    %cst_13 = arith.constant 0.000000e+00 : f32
    %22 = vector.broadcast %cst_13 : f32 to vector<16x64xf32>
    %23 = arith.maximumf %21, %22 : vector<16x64xf32>
    %c832 = arith.constant 832 : index
    %c0_14 = arith.constant 0 : index
    %24 = vector.load %arg2[%c832, %c0_14] : memref<992x256xbf16, #tpu.memory_space<vmem>>, vector<64x32xbf16>
    %c3 = arith.constant 3 : index
    %c0_15 = arith.constant 0 : index
    %25 = vector.load %arg3[%c3, %c0_15] : memref<8x256xf32, #tpu.memory_space<vmem>>, vector<1x32xf32>
    %26 = arith.truncf %23 : vector<16x64xf32> to vector<16x64xbf16>
    %cst_16 = arith.constant dense<0.000000e+00> : vector<16x32xf32>
    %27 = tpu.matmul %26, %24, %cst_16 {dimension_numbers = #tpu.dot_dimension_numbers<[1], [0], [0], [1], [0, 0, 1, 1], [], []>} : vector<16x64xbf16>, vector<64x32xbf16>, vector<16x32xf32> -> vector<16x32xf32>
    %28 = vector.broadcast %25 : vector<1x32xf32> to vector<16x32xf32>
    %29 = arith.addf %27, %28 : vector<16x32xf32>
    %cst_17 = arith.constant 0.000000e+00 : f32
    %30 = vector.broadcast %cst_17 : f32 to vector<16x32xf32>
    %31 = arith.maximumf %29, %30 : vector<16x32xf32>
    %c896 = arith.constant 896 : index
    %c0_18 = arith.constant 0 : index
    %32 = vector.load %arg2[%c896, %c0_18] : memref<992x256xbf16, #tpu.memory_space<vmem>>, vector<32x16xbf16>
    %c4 = arith.constant 4 : index
    %c0_19 = arith.constant 0 : index
    %33 = vector.load %arg3[%c4, %c0_19] : memref<8x256xf32, #tpu.memory_space<vmem>>, vector<1x16xf32>
    %34 = arith.truncf %31 : vector<16x32xf32> to vector<16x32xbf16>
    %cst_20 = arith.constant dense<0.000000e+00> : vector<16x16xf32>
    %35 = tpu.matmul %34, %32, %cst_20 {dimension_numbers = #tpu.dot_dimension_numbers<[1], [0], [0], [1], [0, 0, 1, 1], [], []>} : vector<16x32xbf16>, vector<32x16xbf16>, vector<16x16xf32> -> vector<16x16xf32>
    %36 = vector.broadcast %33 : vector<1x16xf32> to vector<16x16xf32>
    %37 = arith.addf %35, %36 : vector<16x16xf32>
    %cst_21 = arith.constant 0.000000e+00 : f32
    %38 = vector.broadcast %cst_21 : f32 to vector<16x16xf32>
    %39 = arith.maximumf %37, %38 : vector<16x16xf32>
    %c928 = arith.constant 928 : index
    %c0_22 = arith.constant 0 : index
    %40 = vector.load %arg2[%c928, %c0_22] : memref<992x256xbf16, #tpu.memory_space<vmem>>, vector<16x32xbf16>
    %c5 = arith.constant 5 : index
    %c0_23 = arith.constant 0 : index
    %41 = vector.load %arg3[%c5, %c0_23] : memref<8x256xf32, #tpu.memory_space<vmem>>, vector<1x32xf32>
    %42 = arith.truncf %39 : vector<16x16xf32> to vector<16x16xbf16>
    %cst_24 = arith.constant dense<0.000000e+00> : vector<16x32xf32>
    %43 = tpu.matmul %42, %40, %cst_24 {dimension_numbers = #tpu.dot_dimension_numbers<[1], [0], [0], [1], [0, 0, 1, 1], [], []>} : vector<16x16xbf16>, vector<16x32xbf16>, vector<16x32xf32> -> vector<16x32xf32>
    %44 = vector.broadcast %41 : vector<1x32xf32> to vector<16x32xf32>
    %45 = arith.addf %43, %44 : vector<16x32xf32>
    %cst_25 = arith.constant 0.000000e+00 : f32
    %46 = vector.broadcast %cst_25 : f32 to vector<16x32xf32>
    %47 = arith.maximumf %45, %46 : vector<16x32xf32>
    %c944 = arith.constant 944 : index
    %c0_26 = arith.constant 0 : index
    %48 = vector.load %arg2[%c944, %c0_26] : memref<992x256xbf16, #tpu.memory_space<vmem>>, vector<32x16xbf16>
    %c6 = arith.constant 6 : index
    %c0_27 = arith.constant 0 : index
    %49 = vector.load %arg3[%c6, %c0_27] : memref<8x256xf32, #tpu.memory_space<vmem>>, vector<1x16xf32>
    %50 = arith.truncf %47 : vector<16x32xf32> to vector<16x32xbf16>
    %cst_28 = arith.constant dense<0.000000e+00> : vector<16x16xf32>
    %51 = tpu.matmul %50, %48, %cst_28 {dimension_numbers = #tpu.dot_dimension_numbers<[1], [0], [0], [1], [0, 0, 1, 1], [], []>} : vector<16x32xbf16>, vector<32x16xbf16>, vector<16x16xf32> -> vector<16x16xf32>
    %52 = vector.broadcast %49 : vector<1x16xf32> to vector<16x16xf32>
    %53 = arith.addf %51, %52 : vector<16x16xf32>
    %cst_29 = arith.constant 0.000000e+00 : f32
    %54 = vector.broadcast %cst_29 : f32 to vector<16x16xf32>
    %55 = arith.maximumf %53, %54 : vector<16x16xf32>
    %c976 = arith.constant 976 : index
    %c0_30 = arith.constant 0 : index
    %56 = vector.load %arg2[%c976, %c0_30] : memref<992x256xbf16, #tpu.memory_space<vmem>>, vector<1x16xbf16>
    %57 = arith.extf %56 : vector<1x16xbf16> to vector<1x16xf32>
    %c7 = arith.constant 7 : index
    %c0_31 = arith.constant 0 : index
    %58 = vector.load %arg3[%c7, %c0_31] : memref<8x256xf32, #tpu.memory_space<vmem>>, vector<1x1xf32>
    %59 = vector.broadcast %57 : vector<1x16xf32> to vector<16x16xf32>
    %60 = arith.mulf %55, %59 : vector<16x16xf32>
    %cst_32 = arith.constant dense<0.000000e+00> : vector<16xf32>
    %61 = vector.multi_reduction <add>, %60, %cst_32 [1] : vector<16x16xf32> to vector<16xf32>
    %62 = vector.shape_cast %61 : vector<16xf32> to vector<16x1xf32>
    %63 = vector.broadcast %58 : vector<1x1xf32> to vector<16x1xf32>
    %64 = arith.addf %62, %63 : vector<16x1xf32>
    %c0_33 = arith.constant 0 : index
    %c0_34 = arith.constant 0 : index
    %65 = vector.load %arg4[%c0_33, %c0_34] : memref<16x1xf32, #tpu.memory_space<vmem>>, vector<16x1xf32>
    tpu.vector_store %arg4[%c0_33, %c0_34], %64 {strides = array<i32>} : memref<16x1xf32, #tpu.memory_space<vmem>>, vector<16x1xf32>,
    return
  }
  func.func @transform_0(%arg0: i32) -> (i32, i32) {
    %c0_i32 = arith.constant 0 : i32
    %c0_i32_0 = arith.constant 0 : i32
    return %arg0, %c0_i32 : i32, i32
  }
  func.func @transform_1(%arg0: i32) -> (i32, i32) {
    %c0_i32 = arith.constant 0 : i32
    %c0_i32_0 = arith.constant 0 : i32
    %c0_i32_1 = arith.constant 0 : i32
    return %c0_i32, %c0_i32_0 : i32, i32
  }
  func.func @transform_2(%arg0: i32) -> (i32, i32) {
    %c0_i32 = arith.constant 0 : i32
    %c0_i32_0 = arith.constant 0 : i32
    %c0_i32_1 = arith.constant 0 : i32
    return %c0_i32, %c0_i32_0 : i32, i32
  }
  func.func @transform_3(%arg0: i32) -> (i32, i32) {
    %c0_i32 = arith.constant 0 : i32
    %c0_i32_0 = arith.constant 0 : i32
    return %arg0, %c0_i32 : i32, i32
  }
}

</mosaic_0001>

<bundles_post_ra>
// kernel: tpu_custom_call.1
= control target key start
LH: loop header
LB: loop body
LE: loop exit
PB: predicated region body
PF: predicated region fallthrough
CT: control target
= control target key end

     0   :  { %8 = vsyncpa [#allocation3], 0  ;;  %s1613_s0 = inlined_call_operand.hbm [shape: bf16[16,448], index: 0, kind: input, shape index: {}]   ;;  %s1614_s1 = inlined_call_operand.hbm [shape: bf16[992,256], index: 1, kind: input, shape index: {}]   ;;  %s1615_s2 = inlined_call_operand.hbm [shape: f32[8,256], index: 2, kind: input, shape index: {}]   ;;  %s1616_s3 = inlined_call_operand.vmem [shape: f32[16,1], index: 3, kind: output, shape index: {}]  }
   0x1   :  { %9 = vsyncpa [#allocation5], 0  ;;  %s1500_s12 = smov [#allocation4]   ;;  %s1430_s16 = scalar_lea.hbm %s1614_s1, 15872 }
   0x2   :  { %s27_s13 = sshll.u32 %s1500_s12, 4  ;;  %p1431_p0 = scmp.ne.s32.totalorder %s1614_s1, %s1430_s16  ;;  %s28_s13 = int_to_ptr.vmem [resolvable:$true] %s27_s13 }
   0x3   :  { %p1434_p1 = scmp.lt.u32.totalorder %s1430_s16, %s1614_s1 }
   0x5   :  { %p1436_p2 = pnand %p1434_p1, %p1431_p0 }
   0x7   :  { %1439 = shalt.err (!%p1436_p2)
}
   0x8   :  { %s1440_s21 = scalar_lea.vmem %s28_s13, 15872  ;;  %p1445_p4 = scmp.lt.s32.totalorder %s28_s13, %s28_s13 }
   0x9   :  { %p1441_p3 = scmp.ne.s32.totalorder %s28_s13, %s1440_s21  ;;  %p1446_p5 = scmp.lt.s32.totalorder %s1440_s21, %s1440_s21 }
   0xb   :  { %p1447_p6 = por %p1446_p5, %p1445_p4 }
   0xd   :  { %p1448_p7 = pnand %p1447_p6, %p1441_p3 }
   0xf   :  { %1451 = shalt.err (!%p1448_p7)
}
  0x10   :  { %s1501_s22 = smov 128   ;;  %s1502_s23 = smov 8  }
  0x11   :  { %33 = dma.hbm_to_vmem [thread:$0]  %s1614_s1, 15872, %s28_s13, [#allocation5], %s1501_s22, %s1501_s22, %s1502_s23  }
  0x12   :  { %s1503_s26 = smov [#allocation2]   ;;  %s1452_s30 = scalar_lea.hbm %s1613_s0, 512 }
  0x13   :  { %s15_s27 = sshll.u32 %s1503_s26, 4  ;;  %p1453_p8 = scmp.ne.s32.totalorder %s1613_s0, %s1452_s30  ;;  %s16_s27 = int_to_ptr.vmem [resolvable:$true] %s15_s27 }
  0x14   :  { %p1456_p9 = scmp.lt.u32.totalorder %s1452_s30, %s1613_s0 }
  0x16   :  { %p1458_p10 = pnand %p1456_p9, %p1453_p8 }
  0x18   :  { %1461 = shalt.err (!%p1458_p10)
}
  0x19   :  { %s1462_s8 = scalar_lea.vmem %s16_s27, 512  ;;  %p1467_p12 = scmp.lt.s32.totalorder %s16_s27, %s16_s27 }
  0x1a   :  { %p1463_p11 = scmp.ne.s32.totalorder %s16_s27, %s1462_s8  ;;  %p1468_p13 = scmp.lt.s32.totalorder %s1462_s8, %s1462_s8 }
  0x1c   :  { %p1469_p0 = por %p1468_p13, %p1467_p12 }
  0x1e   :  { %p1470_p1 = pnand %p1469_p0, %p1463_p11 }
  0x20   :  { %1473 = shalt.err (!%p1470_p1)
}
  0x21   :  { %s1504_s1 = smov 256   ;;  %s1505_s9 = smov 16  }
  0x22   :  { %21 = dma.hbm_to_vmem [thread:$0]  %s1613_s0, 512, %s16_s27, [#allocation3], %s1504_s1, %s1504_s1, %s1505_s9  }
  0x23   :  { %s1506_s12 = smov [#allocation6]   ;;  %s1474_s16 = scalar_lea.hbm %s1615_s2, 256 }
  0x24   :  { %s40_s13 = sshll.u32 %s1506_s12, 4  ;;  %p1475_p2 = scmp.ne.s32.totalorder %s1615_s2, %s1474_s16  ;;  %s41_s13 = int_to_ptr.vmem [resolvable:$true] %s40_s13 }
  0x25   :  { %p1478_p3 = scmp.lt.u32.totalorder %s1474_s16, %s1615_s2 }
  0x27   :  { %p1480_p4 = pnand %p1478_p3, %p1475_p2 }
  0x29   :  { %1483 = shalt.err (!%p1480_p4)
}
  0x2a   :  { %s1484_s21 = scalar_lea.vmem %s41_s13, 256  ;;  %p1489_p6 = scmp.lt.s32.totalorder %s41_s13, %s41_s13 }
  0x2b   :  { %p1485_p5 = scmp.ne.s32.totalorder %s41_s13, %s1484_s21  ;;  %p1490_p7 = scmp.lt.s32.totalorder %s1484_s21, %s1484_s21 }
  0x2d   :  { %p1491_p8 = por %p1490_p7, %p1489_p6 }
  0x2f   :  { %p1492_p9 = pnand %p1491_p8, %p1485_p5 }
  0x31   :  { %1495 = shalt.err (!%p1492_p9)
}
  0x32   :  { %43 = dma.hbm_to_vmem [thread:$0]  %s1615_s2, 256, %s41_s13, [#allocation5]  }
  0x33   :  { %1496 = dma.done.wait [#allocation3], 512  }
  0x34   :  { %1497 = vsyncadd [#allocation3], 4294966784 }
  0x35   :  { %1498 = dma.done.wait [#allocation5], 16128  }
  0x36   :  { %1499 = vsyncadd [#allocation5], 4294951168  ;;  %v1307_v0 = vld [vmem:[#allocation4 + $0x4] ss:$8 sps:$4 sm:$0xff]   ;;  %v1309_v1 = vld [vmem:[#allocation4] ss:$8 sps:$4 sm:$0xff]  }
  0x37   :  { %429 = vmatprep.subr.bf16.mxu0 %v1307_v0  ;;  %v1310_v2 = vld [vmem:[#allocation4 + $0x14] ss:$8 sps:$4 sm:$0xff]   ;;  %v1312_v3 = vld [vmem:[#allocation4 + $0x10] ss:$8 sps:$4 sm:$0xff]   ;;  %v1313_v4 = vld [vmem:[#allocation4 + $0x24] ss:$8 sps:$4 sm:$0xff]  }
  0x38   :  { %430 = vmatpush1.bf16.msra.mxu0 %v1309_v1  ;;  %v1315_v5 = vld [vmem:[#allocation4 + $0x20] ss:$8 sps:$4 sm:$0xff]   ;;  %v1316_v6 = vld [vmem:[#allocation4 + $0x34] ss:$8 sps:$4 sm:$0xff]   ;;  %v1318_v7 = vld [vmem:[#allocation4 + $0x30] ss:$8 sps:$4 sm:$0xff]  }
  0x39   :  { %431 = vmatprep.subr.bf16.mxu0 %v1310_v2  ;;  %v1319_v8 = vld [vmem:[#allocation4 + $0x44] ss:$8 sps:$4 sm:$0xff]   ;;  %v1321_v9 = vld [vmem:[#allocation4 + $0x40] ss:$8 sps:$4 sm:$0xff]   ;;  %v1322_v10 = vld [vmem:[#allocation4 + $0x54] ss:$8 sps:$4 sm:$0xff]  }
  0x3a   :  { %v1324_v11 = vld [vmem:[#allocation4 + $0x50] ss:$8 sps:$4 sm:$0xff]   ;;  %v1325_v12 = vld [vmem:[#allocation4 + $0x64] ss:$8 sps:$4 sm:$0xff]   ;;  %v1327_v14 = vld [vmem:[#allocation4 + $0x60] ss:$8 sps:$4 sm:$0xff]  }
  0x3b   :  { %v1357_v13 = vld [vmem:[#allocation2 + $0x4] ss:$16 sps:$4 sm:$0xff]   ;;  %v1330_v16 = vld [vmem:[#allocation4 + $0x70] ss:$8 sps:$4 sm:$0xff]   ;;  %v1333_v18 = vld [vmem:[#allocation4 + $0x80] ss:$8 sps:$4 sm:$0xff]  }
  0x3c   :  { %432 = vmatpush1.bf16.msra.mxu0 %v1312_v3  ;;  %v1328_v15 = vld [vmem:[#allocation4 + $0x74] ss:$8 sps:$4 sm:$0xff]   ;;  %461 = vmatprep.mubr.bf16.mxu0 %v1357_v13  ;;  %v1331_v17 = vld [vmem:[#allocation4 + $0x84] ss:$8 sps:$4 sm:$0xff]   ;;  %v1336_v20 = vld [vmem:[#allocation4 + $0x90] ss:$8 sps:$4 sm:$0xff]   ;;  %v116_v13 = vlaneseq }
  0x3d   :  { %433 = vmatprep.subr.bf16.mxu0 %v1313_v4  ;;  %v1334_v19 = vld [vmem:[#allocation4 + $0x94] ss:$8 sps:$4 sm:$0xff]   ;;  %v1337_v21 = vld [vmem:[#allocation4 + $0xa4] ss:$8 sps:$4 sm:$0xff]   ;;  %v1339_v22 = vld [vmem:[#allocation4 + $0xa0] ss:$8 sps:$4 sm:$0xff]  }
  0x3e   :  { %v1340_v23 = vld [vmem:[#allocation4 + $0xb4] ss:$8 sps:$4 sm:$0xff]   ;;  %v1397_v24 = vld [vmem:[#allocation4 + $0x240] ss:$8 sps:$4 sm:$0xff]   ;;  %v1342_v25 = vld [vmem:[#allocation4 + $0xb0] ss:$8 sps:$4 sm:$0xff]  }
  0x3f   :  { %v1398_v26 = vld [vmem:[#allocation4 + $0x1c0] ss:$8 sps:$4 sm:$0xff]   ;;  %v1343_v27 = vld [vmem:[#allocation4 + $0xc4] ss:$8 sps:$4 sm:$0xff]   ;;  %1192 = vmatprep.subr.bf16.mxu1 %v1397_v24  ;;  %v1399_v28 = vld [vmem:[#allocation4 + $0x250] ss:$8 sps:$4 sm:$0xff]  }
  0x40   :  { %434 = vmatpush1.bf16.msra.mxu0 %v1315_v5  ;;  %1193 = vmatpush3.bf16.msra.mxu1 %v1398_v26  ;;  %v1400_v29 = vld [vmem:[#allocation4 + $0x1d0] ss:$8 sps:$4 sm:$0xff]   ;;  %v1401_v30 = vld [vmem:[#allocation4 + $0x260] ss:$8 sps:$4 sm:$0xff]   ;;  %v1346_v32 = vld [vmem:[#allocation4 + $0xd4] ss:$8 sps:$4 sm:$0xff]  }
  0x41   :  { %435 = vmatprep.subr.bf16.mxu0 %v1316_v6  ;;  %1194 = vmatprep.subr.bf16.mxu1 %v1399_v28  ;;  %v1345_v31 = vld [vmem:[#allocation4 + $0xc0] ss:$8 sps:$4 sm:$0xff]   ;;  %v1403_v34 = vld [vmem:[#allocation4 + $0x270] ss:$8 sps:$4 sm:$0xff]   ;;  %v1349_v36 = vld [vmem:[#allocation4 + $0xe4] ss:$8 sps:$4 sm:$0xff]  }
  0x42   :  { %v1402_v33 = vld [vmem:[#allocation4 + $0x1e0] ss:$8 sps:$4 sm:$0xff]   ;;  %v1348_v35 = vld [vmem:[#allocation4 + $0xd0] ss:$8 sps:$4 sm:$0xff]   ;;  %v1352_v41 = vld [vmem:[#allocation4 + $0xf4] ss:$8 sps:$4 sm:$0xff]  }
  0x43   :  { %v1404_v37 = vld [vmem:[#allocation4 + $0x1f0] ss:$8 sps:$4 sm:$0xff]   ;;  %v1405_v38 = vld [vmem:[#allocation4 + $0x280] ss:$8 sps:$4 sm:$0xff]   ;;  %vm425_vm0 = vcmask 523264   ;;  %vm1508_vm1 = vmmov 0  }
  0x44   :  { %436 = vmatpush1.bf16.msra.mxu0 %v1318_v7  ;;  %1195 = vmatpush3.bf16.msra.mxu1 %v1400_v29  ;;  %v1351_v39 = vld [vmem:[#allocation4 + $0xe0] ss:$8 sps:$4 sm:$0xff]   ;;  %v1407_v42 = vld [vmem:[#allocation4 + $0x290] ss:$8 sps:$4 sm:$0xff]   ;;  %v1360_v44 = vld [vmem:[#allocation4 + $0x104] ss:$8 sps:$4 sm:$0xff]  }
  0x45   :  { %437 = vmatprep.subr.bf16.mxu0 %v1319_v8  ;;  %1196 = vmatprep.subr.bf16.mxu1 %v1401_v30  ;;  %v1406_v40 = vld [vmem:[#allocation4 + $0x200] ss:$8 sps:$4 sm:$0xff]   ;;  %v1354_v43 = vld [vmem:[#allocation4 + $0xf0] ss:$8 sps:$4 sm:$0xff]   ;;  %v1394_v47 = vld [vmem:[#allocation2 + $0xc] ss:$16 sps:$4 sm:$0xff]  }
  0x46   :  { %v1355_v45 = vld [vmem:[#allocation2] ss:$16 sps:$4 sm:$0xff]   ;;  %v1363_v48 = vld [vmem:[#allocation4 + $0x114] ss:$8 sps:$4 sm:$0xff]   ;;  %v1366_v50 = vld [vmem:[#allocation4 + $0x124] ss:$8 sps:$4 sm:$0xff]  }
  0x47   :  { %v1358_v46 = vld [vmem:[#allocation4 + $0x100] ss:$8 sps:$4 sm:$0xff]   ;;  %v1361_v49 = vld [vmem:[#allocation4 + $0x110] ss:$8 sps:$4 sm:$0xff]   ;;  %v1369_v52 = vld [vmem:[#allocation4 + $0x134] ss:$8 sps:$4 sm:$0xff]  }
  0x48   :  { %438 = vmatpush1.bf16.msra.mxu0 %v1321_v9  ;;  %1197 = vmatpush3.bf16.msra.mxu1 %v1402_v33  ;;  %v1364_v51 = vld [vmem:[#allocation4 + $0x120] ss:$8 sps:$4 sm:$0xff]   ;;  %v1367_v53 = vld [vmem:[#allocation4 + $0x130] ss:$8 sps:$4 sm:$0xff]   ;;  %v1372_v54 = vld [vmem:[#allocation4 + $0x144] ss:$8 sps:$4 sm:$0xff]  }
  0x49   :  { %439 = vmatprep.subr.bf16.mxu0 %v1322_v10  ;;  %1198 = vmatprep.subr.bf16.mxu1 %v1403_v34  ;;  %v1370_v55 = vld [vmem:[#allocation4 + $0x140] ss:$8 sps:$4 sm:$0xff]   ;;  %v1375_v56 = vld [vmem:[#allocation4 + $0x154] ss:$8 sps:$4 sm:$0xff]   ;;  %v1373_v57 = vld [vmem:[#allocation4 + $0x150] ss:$8 sps:$4 sm:$0xff]  }
  0x4a   :  { %v1378_v58 = vld [vmem:[#allocation4 + $0x164] ss:$8 sps:$4 sm:$0xff]   ;;  %v1376_v59 = vld [vmem:[#allocation4 + $0x160] ss:$8 sps:$4 sm:$0xff]   ;;  %v1381_v60 = vld [vmem:[#allocation4 + $0x174] ss:$8 sps:$4 sm:$0xff]  }
  0x4b   :  { %v1379_v61 = vld [vmem:[#allocation4 + $0x170] ss:$8 sps:$4 sm:$0xff]   ;;  %v1384_v62 = vld [vmem:[#allocation4 + $0x184] ss:$8 sps:$4 sm:$0xff]   ;;  %v1382_v63 = vld [vmem:[#allocation4 + $0x180] ss:$8 sps:$4 sm:$0xff]  }
  0x4c   :  { %440 = vmatpush1.bf16.msra.mxu0 %v1324_v11  ;;  %1199 = vmatpush3.bf16.msra.mxu1 %v1404_v37  ;;  %v1387_v0 = vld [vmem:[#allocation4 + $0x194] ss:$8 sps:$4 sm:$0xff]   ;;  %v1385_v1 = vld [vmem:[#allocation4 + $0x190] ss:$8 sps:$4 sm:$0xff]   ;;  %v1390_v2 = vld [vmem:[#allocation4 + $0x1a4] ss:$8 sps:$4 sm:$0xff]  }
  0x4d   :  { %441 = vmatprep.subr.bf16.mxu0 %v1325_v12  ;;  %1200 = vmatprep.subr.bf16.mxu1 %v1405_v38  ;;  %v1388_v3 = vld [vmem:[#allocation4 + $0x1a0] ss:$8 sps:$4 sm:$0xff]   ;;  %v1393_v4 = vld [vmem:[#allocation4 + $0x1b4] ss:$8 sps:$4 sm:$0xff]   ;;  %v1391_v5 = vld [vmem:[#allocation4 + $0x1b0] ss:$8 sps:$4 sm:$0xff]  }
  0x4e   :  { %v1396_v6 = vld [vmem:[#allocation2 + $0x8] ss:$16 sps:$4 sm:$0xff]   ;;  %v1507_v12 = vmov 0.0   ;;  %vm900_vm2 = vcmask 261120   ;;  %vm957_vm3 = vcmask 130048   ;;  %vm1085_vm4 = vcmask 7168  }
  0x4f   :  { %v1408_v7 = vld [vmem:[#allocation4 + $0x210] ss:$8 sps:$4 sm:$0xff]   ;;  %v1409_v8 = vld [vmem:[#allocation4 + $0x2a0] ss:$8 sps:$4 sm:$0xff]  }
  0x50   :  { %442 = vmatpush1.bf16.msra.mxu0 %v1327_v14  ;;  %1201 = vmatpush3.bf16.msra.mxu1 %v1406_v40  ;;  %v1410_v9 = vld [vmem:[#allocation4 + $0x220] ss:$8 sps:$4 sm:$0xff]   ;;  %v1411_v10 = vld [vmem:[#allocation4 + $0x2b0] ss:$8 sps:$4 sm:$0xff]   ;;  %v1567_v14 = vshrl.u32 %v116_v13, 7 }
  0x51   :  { %443 = vmatprep.subr.bf16.mxu0 %v1328_v15  ;;  %1202 = vmatprep.subr.bf16.mxu1 %v1407_v42  ;;  %v1412_v11 = vld [vmem:[#allocation4 + $0x230] ss:$8 sps:$4 sm:$0xff]   ;;  %v1413_v34 = vld [vmem:[#allocation4 + $0x2c0] ss:$8 sps:$4 sm:$0xff]  }
  0x52   :  { %v118_v15 = vsub.s32 0, %v1567_v14  ;;  %v1416_v37 = vld [vmem:[#allocation4 + $0x2f0] ss:$8 sps:$4 sm:$0xff]   ;;  %v1417_v38 = vld [vmem:[#allocation4 + $0x300] ss:$8 sps:$4 sm:$0xff]  }
  0x53   :  { %v1419_v40 = vld [vmem:[#allocation4 + $0x320] ss:$8 sps:$4 sm:$0xff]  }
  0x54   :  { %444 = vmatpush1.bf16.msra.mxu0 %v1330_v16  ;;  %1203 = vmatpush3.bf16.msra.mxu1 %v1408_v7  ;;  %v114_v16 = vld [vmem:[#allocation6] ss:$8 sm:$0x3] }
  0x55   :  { %445 = vmatprep.subr.bf16.mxu0 %v1331_v17  ;;  %1204 = vmatprep.subr.bf16.mxu1 %v1409_v8  ;;  %v122_v17 = vsub.s32 1, %v1567_v14 }
  0x58   :  { %446 = vmatpush1.bf16.msra.mxu0 %v1333_v18  ;;  %1205 = vmatpush3.bf16.msra.mxu1 %v1410_v9  ;;  %v119_v18 = vrot.slane %v114_v16, %v118_v15 }
  0x59   :  { %447 = vmatprep.subr.bf16.mxu0 %v1334_v19  ;;  %1206 = vmatprep.subr.bf16.mxu1 %v1411_v10  ;;  %v123_v19 = vrot.slane %v114_v16, %v122_v17 }
  0x5c   :  { %448 = vmatpush1.bf16.msra.mxu0 %v1336_v20  ;;  %1207 = vmatpush3.bf16.msra.mxu1 %v1412_v11 }
  0x5d   :  { %449 = vmatprep.subr.bf16.mxu0 %v1337_v21  ;;  %1236 = vmatprep.subr.bf16.mxu1 %v1507_v12 }
  0x60   :  { %450 = vmatpush1.bf16.msra.mxu0 %v1339_v22 }
  0x61   :  { %451 = vmatprep.subr.bf16.mxu0 %v1340_v23 }
  0x64   :  { %452 = vmatpush1.bf16.msra.mxu0 %v1342_v25 }
  0x65   :  { %453 = vmatprep.subr.bf16.mxu0 %v1343_v27 }
  0x68   :  { %454 = vmatpush1.bf16.msra.mxu0 %v1345_v31 }
  0x69   :  { %455 = vmatprep.subr.bf16.mxu0 %v1346_v32 }
  0x6c   :  { %456 = vmatpush1.bf16.msra.mxu0 %v1348_v35  ;;  %v1414_v35 = vld [vmem:[#allocation4 + $0x2d0] ss:$8 sps:$4 sm:$0xff]  }
  0x6d   :  { %457 = vmatprep.subr.bf16.mxu0 %v1349_v36  ;;  %v1415_v36 = vld [vmem:[#allocation4 + $0x2e0] ss:$8 sps:$4 sm:$0xff]  }
  0x70   :  { %458 = vmatpush1.bf16.msra.mxu0 %v1351_v39  ;;  %v1418_v39 = vld [vmem:[#allocation4 + $0x310] ss:$8 sps:$4 sm:$0xff]  }
  0x71   :  { %459 = vmatprep.subr.bf16.mxu0 %v1352_v41  ;;  %v1420_v41 = vld [vmem:[#allocation4 + $0x330] ss:$8 sps:$4 sm:$0xff]  }
  0x74   :  { %460 = vmatpush1.bf16.msra.mxu0 %v1354_v43  ;;  %v551_v43 = vld [vmem:[#allocation6 + $0x1] ss:$0 sm:$0xff] }
  0x75   :  { %472 = vmatprep.subr.bf16.mxu0 %v1360_v44 }
  0x77   :  { %462 = vmatmul.mubr.bf16.vlgmr.msra.gmra.mrb[0].mxu0 %v1355_v45 }
  0x78   :  { %473 = vmatpush1.bf16.msra.mxu0 %v1358_v46  ;;  %1154 = vmatprep.mubr.msk.bf16.mxu0 %vm425_vm0, %v1394_v47 }
  0x79   :  { %474 = vmatprep.subr.bf16.mxu0 %v1363_v48 }
  0x7c   :  { %475 = vmatpush1.bf16.msra.mxu0 %v1361_v49 }
  0x7d   :  { %476 = vmatprep.subr.bf16.mxu0 %v1366_v50 }
  0x80   :  { %477 = vmatpush1.bf16.msra.mxu0 %v1364_v51 }
  0x81   :  { %478 = vmatprep.subr.bf16.mxu0 %v1369_v52 }
  0x84   :  { %479 = vmatpush1.bf16.msra.mxu0 %v1367_v53  ;;  %v1421_v53 = vld [vmem:[#allocation4 + $0x340] ss:$8 sps:$4 sm:$0xff]  }
  0x85   :  { %480 = vmatprep.subr.bf16.mxu0 %v1372_v54 }
  0x88   :  { %481 = vmatpush1.bf16.msra.mxu0 %v1370_v55  ;;  %v1422_v55 = vld [vmem:[#allocation4 + $0x350] ss:$8 sps:$4 sm:$0xff]  }
  0x89   :  { %482 = vmatprep.subr.bf16.mxu0 %v1375_v56  ;;  %v1423_v56 = vld [vmem:[#allocation4 + $0x360] ss:$8 sps:$4 sm:$0xff]  }
  0x8c   :  { %483 = vmatpush1.bf16.msra.mxu0 %v1373_v57  ;;  %v1424_v57 = vld [vmem:[#allocation4 + $0x370] ss:$8 sps:$4 sm:$0xff]  }
  0x8d   :  { %484 = vmatprep.subr.bf16.mxu0 %v1378_v58  ;;  %v709_v58 = vld [vmem:[#allocation6 + $0x2] ss:$0 sm:$0xff] }
  0x90   :  { %485 = vmatpush1.bf16.msra.mxu0 %v1376_v59 }
  0x91   :  { %486 = vmatprep.subr.bf16.mxu0 %v1381_v60 }
  0x94   :  { %487 = vmatpush1.bf16.msra.mxu0 %v1379_v61 }
  0x95   :  { %488 = vmatprep.subr.bf16.mxu0 %v1384_v62 }
  0x98   :  { %489 = vmatpush1.bf16.msra.mxu0 %v1382_v63 }
  0x99   :  { %490 = vmatprep.subr.bf16.mxu0 %v1387_v0 }
  0x9c   :  { %491 = vmatpush1.bf16.msra.mxu0 %v1385_v1 }
  0x9d   :  { %492 = vmatprep.subr.bf16.mxu0 %v1390_v2 }
  0xa0   :  { %493 = vmatpush1.bf16.msra.mxu0 %v1388_v3 }
  0xa1   :  { %494 = vmatprep.subr.bf16.mxu0 %v1393_v4  ;;  %v1425_v4 = vld [vmem:[#allocation4 + $0x380] ss:$8 sps:$4 sm:$0xff]  }
  0xa4   :  { %495 = vmatpush1.bf16.msra.mxu0 %v1391_v5  ;;  %v1426_v5 = vld [vmem:[#allocation4 + $0x390] ss:$8 sps:$4 sm:$0xff]  }
  0xa7   :  { %505 = vmatmul.mubr.bf16.vlgmr.msra.gmra.mrb[0].mxu0 %v1396_v6  ;;  %v810_v6 = vld [vmem:[#allocation6 + $0x3] ss:$0 sm:$0xff] }
 0x17a   :  { %v506_v20 = vpop.f32.mrb[0].mxu0 }
 0x17b   :  { %v1290_v21 = vadd.f32 %v506_v20, %v119_v18  ;;  %v508_v22 = vpop.f32.mrb[1].mxu0  ;;  %v886_v20 = vld [vmem:[#allocation6 + $0x4] ss:$0 sm:$0xff] }
 0x17c   :  { %v1291_v23 = vadd.f32 %v508_v22, %v123_v19  ;;  %v510_v24 = vpop.f32.mrb[2].mxu0 }
 0x17d   :  { %v1292_v25 = vadd.f32 %v510_v24, %v119_v18  ;;  %v512_v26 = vpop.f32.mrb[3].mxu0  ;;  %v515_v28 = vmax.f32 %v1290_v21, 0.0 }
 0x17e   :  { %v1293_v27 = vadd.f32 %v512_v26, %v123_v19  ;;  %v516_v30 = vmax.f32 %v1291_v23, 0.0  ;;  %v1427_v19 = vld [vmem:[#allocation4 + $0x3a0] ss:$8 sps:$4 sm:$0xff]  }
 0x17f   :  { %v517_v29 = vmax.f32 %v1292_v25, 0.0 }
 0x180   :  { %v518_v31 = vmax.f32 %v1293_v27, 0.0 }
 0x181   :  { %v552_v32 = vpack.c.bf16 %v517_v29, %v515_v28 }
 0x182   :  { %v553_v33 = vpack.c.bf16 %v518_v31, %v516_v30  ;;  %v1428_v30 = vld [vmem:[#allocation4 + $0x3b0] ss:$8 sps:$4 sm:$0xff]   ;;  %v1429_v31 = vld [vmem:[#allocation4 + $0x3c0] ss:$8 sps:$4 sm:$0xff]  }
 0x184   :  { %682 = vmatprep.mubr.bf16.mxu1 %v553_v33 }
 0x185   :  { %683 = vmatmul.mubr.bf16.vlgmr.msra.gmra.mrb[0].mxu1 %v552_v32  ;;  %v949_v32 = vld [vmem:[#allocation6 + $0x5] ss:$0 sm:$0xff] }
 0x186   :  { %1237 = vmatpush3.bf16.msra.mxu1 %v1413_v34  ;;  %1252 = vmatprep.mubr.msk.bf16.mxu1 %vm1508_vm1, %v1507_v12 }
 0x187   :  { %1238 = vmatprep.subr.bf16.mxu1 %v1507_v12 }
 0x18a   :  { %1239 = vmatpush3.bf16.msra.mxu1 %v1414_v35 }
 0x18b   :  { %1240 = vmatprep.subr.bf16.mxu1 %v1507_v12 }
 0x18e   :  { %1241 = vmatpush3.bf16.msra.mxu1 %v1415_v36 }
 0x18f   :  { %1242 = vmatprep.subr.bf16.mxu1 %v1507_v12 }
 0x192   :  { %1243 = vmatpush3.bf16.msra.mxu1 %v1416_v37 }
 0x193   :  { %1244 = vmatprep.subr.bf16.mxu1 %v1507_v12 }
 0x196   :  { %1245 = vmatpush3.bf16.msra.mxu1 %v1417_v38 }
 0x197   :  { %1246 = vmatprep.subr.bf16.mxu1 %v1507_v12 }
 0x19a   :  { %1247 = vmatpush3.bf16.msra.mxu1 %v1418_v39 }
 0x19b   :  { %1248 = vmatprep.subr.bf16.mxu1 %v1507_v12 }
 0x19e   :  { %1249 = vmatpush3.bf16.msra.mxu1 %v1419_v40 }
 0x19f   :  { %1250 = vmatprep.subr.bf16.mxu1 %v1507_v12 }
 0x1a2   :  { %1251 = vmatpush3.bf16.msra.mxu1 %v1420_v41 }
 0x1a3   :  { %1256 = vmatprep.subr.bf16.mxu1 %v1507_v12 }
 0x258   :  { %v1208_v42 = vpop.f32.mrb[0].mxu1 }
 0x259   :  { %v1209_v44 = vpop.f32.mrb[1].mxu1 }
 0x25a   :  { %v1210_v45 = vadd.f32 %v1209_v44, %v1208_v42  ;;  %v1211_v46 = vpop.f32.mrb[2].mxu1  ;;  %v1068_v42 = vld [vmem:[#allocation4 + $0x3d0] sm:$0x1]  ;;  %v1008_v44 = vld [vmem:[#allocation6 + $0x6] ss:$0 sm:$0xff] }
 0x25b   :  { %v1212_v47 = vpop.f32.mrb[3].mxu1 }
 0x25c   :  { %v685_v48 = vadd.f32 %v1210_v45, %v551_v43  ;;  %v1213_v49 = vadd.f32 %v1212_v47, %v1211_v46 }
 0x25e   :  { %v688_v50 = vadd.f32 %v1213_v49, %v551_v43  ;;  %v691_v51 = vmax.f32 %v685_v48, 0.0  ;;  %v1069_v43 = vunpack.c.l.bf16 %v1068_v42 }
 0x260   :  { %v692_v52 = vmax.f32 %v688_v50, 0.0  ;;  %v1074_v47 = vrot.slane %v1069_v43, %v118_v15 }
 0x262   :  { %v710_v54 = vpack.c.bf16 %v692_v52, %v691_v51 }
 0x264   :  { %1253 = vmatmul.mubr.bf16.vlgmr.msra.gmra.mrb[4].mxu1 %v710_v54 }
 0x265   :  { %1257 = vmatpush3.bf16.msra.mxu1 %v1421_v53  ;;  %1264 = vmatprep.mubr.msk.bf16.mxu1 %vm1508_vm1, %v1507_v12 }
 0x266   :  { %1258 = vmatprep.subr.bf16.mxu1 %v1507_v12 }
 0x269   :  { %1259 = vmatpush3.bf16.msra.mxu1 %v1422_v55 }
 0x26a   :  { %1260 = vmatprep.subr.bf16.mxu1 %v1507_v12 }
 0x26d   :  { %1261 = vmatpush3.bf16.msra.mxu1 %v1423_v56 }
 0x26e   :  { %1262 = vmatprep.subr.bf16.mxu1 %v1507_v12 }
 0x271   :  { %1263 = vmatpush3.bf16.msra.mxu1 %v1424_v57  ;;  %v1070_v57 = vld [vmem:[#allocation6 + $0x7] ss:$0 sm:$0xff] }
 0x272   :  { %1268 = vmatprep.subr.bf16.mxu1 %v1507_v12 }
 0x337   :  { %v793_v59 = vpop.f32.mrb[4].mxu1 }
 0x338   :  { %v794_v60 = vadd.f32 %v793_v59, %v709_v58  ;;  %v1254_v61 = vpop.f32.mrb[5].mxu1 }
 0x339   :  { %v796_v62 = vpop.f32.mrb[6].mxu1 }
 0x33a   :  { %v797_v63 = vadd.f32 %v796_v62, %v709_v58  ;;  %v1255_v0 = vpop.f32.mrb[7].mxu1  ;;  %v800_v1 = vmax.f32 %v794_v60, 0.0 }
 0x33c   :  { %v801_v2 = vmax.f32 %v797_v63, 0.0 }
 0x33e   :  { %v811_v3 = vpack.c.bf16 %v801_v2, %v800_v1 }
 0x340   :  { %1265 = vmatmul.mubr.msk.bf16.vlgmr.msra.gmra.mrb[8].mxu1 %vm425_vm0, %v811_v3 }
 0x341   :  { %1272 = vmatprep.mubr.msk.bf16.mxu1 %vm1508_vm1, %v1507_v12  ;;  %1269 = vmatpush3.bf16.msra.mxu1 %v1425_v4 }
 0x342   :  { %1270 = vmatprep.subr.bf16.mxu1 %v1507_v12 }
 0x345   :  { %1271 = vmatpush3.bf16.msra.mxu1 %v1426_v5 }
 0x346   :  { %1276 = vmatprep.subr.bf16.mxu1 %v1507_v12 }
 0x413   :  { %v873_v7 = vpop.f32.mrb[8].mxu1 }
 0x414   :  { %v874_v8 = vadd.f32 %v873_v7, %v810_v6  ;;  %v1266_v9 = vpop.f32.mrb[9].mxu1 }
 0x415   :  { %v876_v10 = vpop.f32.mrb[10].mxu1 }
 0x416   :  { %v877_v11 = vadd.f32 %v876_v10, %v810_v6  ;;  %v1267_v13 = vpop.f32.mrb[11].mxu1  ;;  %v880_v16 = vmax.f32 %v874_v8, 0.0 }
 0x418   :  { %v881_v17 = vmax.f32 %v877_v11, 0.0 }
 0x41a   :  { %v887_v18 = vpack.c.bf16 %v881_v17, %v880_v16 }
 0x41c   :  { %1273 = vmatmul.mubr.msk.bf16.vlgmr.msra.gmra.mrb[12].mxu1 %vm900_vm2, %v887_v18 }
 0x41d   :  { %1278 = vmatprep.mubr.msk.bf16.mxu1 %vm1508_vm1, %v1507_v12  ;;  %1277 = vmatpush3.bf16.msra.mxu1 %v1427_v19 }
 0x41e   :  { %1282 = vmatprep.subr.bf16.mxu1 %v1507_v12 }
 0x4ef   :  { %v938_v21 = vpop.f32.mrb[12].mxu1 }
 0x4f0   :  { %v939_v22 = vadd.f32 %v938_v21, %v886_v20  ;;  %v1274_v23 = vpop.f32.mrb[13].mxu1 }
 0x4f1   :  { %v941_v24 = vpop.f32.mrb[14].mxu1 }
 0x4f2   :  { %v942_v25 = vadd.f32 %v941_v24, %v886_v20  ;;  %v1275_v26 = vpop.f32.mrb[15].mxu1  ;;  %v945_v27 = vmax.f32 %v939_v22, 0.0 }
 0x4f4   :  { %v946_v28 = vmax.f32 %v942_v25, 0.0 }
 0x4f6   :  { %v950_v29 = vpack.c.bf16 %v946_v28, %v945_v27 }
 0x4f8   :  { %1279 = vmatmul.mubr.msk.bf16.vlgmr.msra.gmra.mrb[16].mxu1 %vm957_vm3, %v950_v29 }
 0x4f9   :  { %1286 = vmatprep.mubr.msk.bf16.mxu1 %vm1508_vm1, %v1507_v12  ;;  %1283 = vmatpush3.bf16.msra.mxu1 %v1428_v30 }
 0x4fa   :  { %1284 = vmatprep.subr.bf16.mxu1 %v1507_v12 }
 0x4fd   :  { %1285 = vmatpush3.bf16.msra.mxu1 %v1429_v31 }
 0x5cb   :  { %v995_v33 = vpop.f32.mrb[16].mxu1 }
 0x5cc   :  { %v996_v34 = vadd.f32 %v995_v33, %v949_v32  ;;  %v1280_v35 = vpop.f32.mrb[17].mxu1 }
 0x5cd   :  { %v998_v36 = vpop.f32.mrb[18].mxu1 }
 0x5ce   :  { %v999_v37 = vadd.f32 %v998_v36, %v949_v32  ;;  %v1281_v38 = vpop.f32.mrb[19].mxu1  ;;  %v1002_v39 = vmax.f32 %v996_v34, 0.0 }
 0x5d0   :  { %v1003_v40 = vmax.f32 %v999_v37, 0.0 }
 0x5d2   :  { %v1009_v41 = vpack.c.bf16 %v1003_v40, %v1002_v39 }
 0x5d4   :  { %1287 = vmatmul.mubr.msk.bf16.vlgmr.msra.gmra.mrb[20].mxu1 %vm900_vm2, %v1009_v41 }
 0x6a7   :  { %v1059_v45 = vpop.f32.mrb[20].mxu1 }
 0x6a8   :  { %v1060_v46 = vadd.f32 %v1059_v45, %v1008_v44  ;;  %v1288_v12 = vpop.f32.mrb[21].mxu1 }
 0x6a9   :  { %v1062_v48 = vpop.f32.mrb[22].mxu1 }
 0x6aa   :  { %v1066_v49 = vmax.f32 %v1060_v46, 0.0  ;;  %v1063_v50 = vadd.f32 %v1062_v48, %v1008_v44  ;;  %v1289_v51 = vpop.f32.mrb[23].mxu1 }
 0x6ac   :  { %v1067_v52 = vmax.f32 %v1063_v50, 0.0  ;;  %v1075_v53 = vmul.f32 %v1074_v47, %v1066_v49 }
 0x6ae   :  { %v1077_v54 = vsel %vm957_vm3, %v1075_v53, 0.0  ;;  %v1076_v55 = vmul.f32 %v1074_v47, %v1067_v52 }
 0x6af   :  { %1078 = vadd.xlane.f32.xlu0 %v1077_v54 }
 0x6b0   :  { %v1080_v56 = vsel %vm957_vm3, %v1076_v55, 0.0 }
 0x6b3   :  { %1081 = vadd.xlane.f32.xlu0 %v1080_v56 }
 0x73c   :  { %v1079_v58 = vpop.xlane.xlu0 %1078 }
 0x73d   :  { %v1083_v59 = vadd.f32 %v1079_v58, %v1070_v57 }
 0x73f   :  { %1086 = vst.msk [vmem:[%s1616_s3] sm:$0xff] %vm1085_vm4, %v1083_v59 }
 0x740   :  { %v1082_v14 = vpop.xlane.xlu0 %1081 }
 0x741   :  { %v1084_v15 = vadd.f32 %v1082_v14, %v1070_v57 }
 0x743   :  { %1087 = vst.msk [vmem:[%s1616_s3 + $0x8] sm:$0xff] %vm1085_vm4, %v1084_v15 }
 0x744   :  { %1092 = vsyncpa [#allocation3], 1 }
 0x745   :  { %1093 = vsyncpa [#allocation5], 1 }

</bundles_post_ra>
